<compile_context>
chip_gen: v5e
topology: v5e:2x2
jax: 0.10.0
libtpu: 0.0.40
codegen_flags: <defaults>
</compile_context>

<pallas_src>
import jax
import jax.numpy as jnp
import numpy as np
from jax.experimental import pallas as pl
from jax.experimental.pallas import tpu as pltpu

INPUT_CHANNELS = 4
HIDDEN_CHANNELS = 32
DEFAULT_TILE_B = 8192                 # cap at <=16384 on v7x (64 MiB VMEM/TC)
VMEM_LIMIT_BYTES = 32 * 1024 * 1024   # plenty for ~11.3 MiB of live buffers


def _round_up(n, m):
    return ((n + m - 1) // m) * m


def _converter_kernel(z_ref, w_ref, b_ref, s_ref, base_ref, hmask_ref, out_ref):
    # z_ref: (TB, rows)      w_ref: (rows, hc)     b_ref: (1, hc)
    # s_ref: (hc, rows*ic)   base_ref: (1, rows*ic)
    # hmask_ref: (1, rows)   1.0 on h columns (clamped), 0.0 on x columns.
    z = z_ref[...]                                            # (TB, rows) f32
    # h.clamp(-1, 1); x columns pass through untouched (exact, inf/NaN-safe).
    z_sel = jnp.where(hmask_ref[...] > 0.5, jnp.clip(z, -1.0, 1.0), z)

    # ---- wrapped model: fused tanh MLP cell (one MXU matmul + EUP tanh) ----
    # Mosaic's f32 MXU path is full precision; accumulation pinned to f32.
    # TODO(synk): substitute any other user cell body here.
    model_out = jnp.tanh(
        jnp.dot(z_sel, w_ref[...], preferred_element_type=jnp.float32)
        + b_ref[...])                                         # (TB, hc)

    # ---- assemble flattened output rows: identity plane + column-0 scatter
    #      of model_out, expressed as a matmul against a constant 0/1
    #      selection matrix -> lane-dense store (last dim = rows*ic = 144). ----
    out_ref[...] = (
        jnp.dot(model_out, s_ref[...], preferred_element_type=jnp.float32)
        + base_ref[...]).astype(out_ref.dtype)


def continuous_rnn_converter(z, wx, wh, b,
                             input_channels=INPUT_CHANNELS,
                             hidden_channels=HIDDEN_CHANNELS,
                             tile_b=DEFAULT_TILE_B):
    """z: (..., ic+hc) float32 -> out: (..., ic+hc, ic) float32."""
    ic, hc = input_channels, hidden_channels
    rows = ic + hc
    cols = rows * ic

    batch_dims = z.shape[:-1]
    b_flat = int(np.prod(batch_dims)) if batch_dims else 1

    # ---- host-built constants (computed once, outside the kernel) ----
    w = jnp.concatenate([jnp.asarray(wx, jnp.float32),
                         jnp.asarray(wh, jnp.float32)], axis=0)   # (rows, hc)
    bias = jnp.asarray(b, jnp.float32).reshape(1, hc)

    # selection matrix: model_out[:, j] -> flat column (ic + j) * ic
    s_np = np.zeros((hc, cols), np.float32)
    s_np[np.arange(hc), (ic + np.arange(hc)) * ic] = 1.0
    # flattened identity plane: out_base[i, i] = 1  -> flat column i*(ic+1)
    base_np = np.zeros((1, cols), np.float32)
    base_np[0, np.arange(ic) * (ic + 1)] = 1.0
    # h-column mask (which columns get clamped to [-1, 1])
    hmask_np = np.concatenate([np.zeros((ic,), np.float32),
                               np.ones((hc,), np.float32)])[None, :]

    # ---- flatten; pad batch only to the sublane quantum (8) ----
    z2 = jnp.asarray(z, jnp.float32).reshape(b_flat, rows)
    b8 = _round_up(b_flat, 8)
    if b8 != b_flat:
        z2 = jnp.pad(z2, ((0, b8 - b_flat), (0, 0)))

    # ---- tile selection ----
    if b8 <= tile_b:
        tb = b8                                      # single block
    else:
        # >=2 grid steps so both v7x TensorCores get work; capped at tile_b.
        tb = min(tile_b, _round_up((b_flat + 1) // 2, 8))
    grid = (pl.cdiv(b8, tb),)                        # edge block masked by pipeline

    # advisory cost hint for XLA scheduling around a long mem-bound call
    flops = (2 * rows * hc + 2 * hc * cols) * b8
    bytes_accessed = (rows + cols) * 4 * b8 + (rows * hc + hc * cols
                                               + 2 * cols + rows + hc) * 4
    transcendentals = hc * b8

    out = pl.pallas_call(
        _converter_kernel,
        out_shape=jax.ShapeDtypeStruct((b8, cols), jnp.float32),
        grid=grid,
        in_specs=[
            pl.BlockSpec((tb, rows), lambda i: (i, 0)),      # z (tiled)
            pl.BlockSpec((rows, hc), lambda i: (0, 0)),      # fused W (resident)
            pl.BlockSpec((1, hc), lambda i: (0, 0)),         # bias
            pl.BlockSpec((hc, cols), lambda i: (0, 0)),      # selection matrix
            pl.BlockSpec((1, cols), lambda i: (0, 0)),       # identity plane
            pl.BlockSpec((1, rows), lambda i: (0, 0)),       # h-column mask
        ],
        out_specs=pl.BlockSpec((tb, cols), lambda i: (i, 0)),
        compiler_params=pltpu.CompilerParams(
            dimension_semantics=("parallel",),
            vmem_limit_bytes=VMEM_LIMIT_BYTES),
        cost_estimate=pl.CostEstimate(flops=flops,
                                      transcendentals=transcendentals,
                                      bytes_accessed=bytes_accessed),
    )(z2, w, bias, jnp.asarray(s_np), jnp.asarray(base_np),
      jnp.asarray(hmask_np))

    out = out[:b_flat].reshape(*batch_dims, rows, ic)
    return out


def _reference(z, wx, wh, b, ic=INPUT_CHANNELS, hc=HIDDEN_CHANNELS):
    x = z[..., :ic]
    h = jnp.clip(z[..., ic:], -1.0, 1.0)
    model_out = jnp.tanh(
        jnp.dot(x, wx, precision=jax.lax.Precision.HIGHEST)
        + jnp.dot(h, wh, precision=jax.lax.Precision.HIGHEST)
        + b[0])
    batch_dims = model_out.shape[:-1]
    out_base = jnp.zeros((ic + hc, ic), jnp.float32)
    out_base = out_base.at[jnp.arange(ic), jnp.arange(ic)].set(1.0)
    out = jnp.broadcast_to(out_base, (*batch_dims, ic + hc, ic))
    out = out.at[..., ic:, 0].set(model_out)
    return out


if __name__ == "__main__":
    key = jax.random.PRNGKey(0)
    k_z, k_wx, k_wh, k_b = jax.random.split(key, 4)

    ic, hc = INPUT_CHANNELS, HIDDEN_CHANNELS
    # small example: leading batch dims (2, 8), channel dim ic+hc = 36
    z = jax.random.normal(k_z, (2, 8, ic + hc), dtype=jnp.float32) * 2.0

    # deterministic synthetic parameters for the wrapped model cell
    wx = jax.random.normal(k_wx, (ic, hc), dtype=jnp.float32) * 0.1
    wh = jax.random.normal(k_wh, (hc, hc), dtype=jnp.float32) * 0.1
    b = jax.random.normal(k_b, (1, hc), dtype=jnp.float32) * 0.1

    out = continuous_rnn_converter(z, wx, wh, b)
    out = jax.block_until_ready(out)

    ref = jax.block_until_ready(_reference(z, wx, wh, b))
    assert out.shape == (2, 8, ic + hc, ic), out.shape
    np.testing.assert_allclose(np.asarray(out), np.asarray(ref),
                               rtol=1e-5, atol=1e-5)
    print("KERNEL_OK")
</pallas_src>

<mosaic_0001>
module attributes {stable_mosaic.version = 11 : i64} {
  func.func @_converter_kernel(%arg0: i32, %arg1: memref<16x36xf32, #tpu.memory_space<vmem>>, %arg2: memref<36x32xf32, #tpu.memory_space<vmem>>, %arg3: memref<1x32xf32, #tpu.memory_space<vmem>>, %arg4: memref<32x144xf32, #tpu.memory_space<vmem>>, %arg5: memref<1x144xf32, #tpu.memory_space<vmem>>, %arg6: memref<1x36xf32, #tpu.memory_space<vmem>>, %arg7: memref<16x144xf32, #tpu.memory_space<vmem>>) attributes {dimension_semantics = [#tpu.dimension_semantics<parallel>], iteration_bounds = array<i64: 1>, scalar_prefetch = 0 : i64, scratch_operands = 0 : i64, tpu.core_type = #tpu.core_type<tc>, window_params = [{transform_indices = @transform_0, window_bounds = array<i64: 16, 36>}, {pipeline_mode = #tpu.pipeline_mode<synchronous>, transform_indices = @transform_1, window_bounds = array<i64: 36, 32>}, {pipeline_mode = #tpu.pipeline_mode<synchronous>, transform_indices = @transform_2, window_bounds = array<i64: 1, 32>}, {pipeline_mode = #tpu.pipeline_mode<synchronous>, transform_indices = @transform_3, window_bounds = array<i64: 32, 144>}, {pipeline_mode = #tpu.pipeline_mode<synchronous>, transform_indices = @transform_4, window_bounds = array<i64: 1, 144>}, {pipeline_mode = #tpu.pipeline_mode<synchronous>, transform_indices = @transform_5, window_bounds = array<i64: 1, 36>}, {transform_indices = @transform_6, window_bounds = array<i64: 16, 144>}]} {
    %c0 = arith.constant 0 : index
    %c0_0 = arith.constant 0 : index
    %0 = vector.load %arg1[%c0, %c0_0] : memref<16x36xf32, #tpu.memory_space<vmem>>, vector<16x36xf32>
    %c0_1 = arith.constant 0 : index
    %c0_2 = arith.constant 0 : index
    %1 = vector.load %arg6[%c0_1, %c0_2] : memref<1x36xf32, #tpu.memory_space<vmem>>, vector<1x36xf32>
    %cst = arith.constant 5.000000e-01 : f32
    %2 = vector.broadcast %cst : f32 to vector<1x36xf32>
    %3 = arith.cmpf ogt, %1, %2 : vector<1x36xf32>
    %cst_3 = arith.constant -1.000000e+00 : f32
    %cst_4 = arith.constant 1.000000e+00 : f32
    %4 = vector.broadcast %cst_3 : f32 to vector<16x36xf32>
    %5 = arith.maximumf %4, %0 : vector<16x36xf32>
    %6 = vector.broadcast %cst_4 : f32 to vector<16x36xf32>
    %7 = arith.minimumf %6, %5 : vector<16x36xf32>
    %8 = vector.shape_cast %3 : vector<1x36xi1> to vector<1x36xi1>
    %9 = vector.broadcast %8 : vector<1x36xi1> to vector<16x36xi1>
    %10 = arith.select %9, %7, %0 : vector<16x36xi1>, vector<16x36xf32>
    %c0_5 = arith.constant 0 : index
    %c0_6 = arith.constant 0 : index
    %11 = vector.load %arg2[%c0_5, %c0_6] : memref<36x32xf32, #tpu.memory_space<vmem>>, vector<36x32xf32>
    %cst_7 = arith.constant dense<0.000000e+00> : vector<16x32xf32>
    %12 = tpu.matmul %10, %11, %cst_7 {dimension_numbers = #tpu.dot_dimension_numbers<[1], [0], [0], [1], [0, 0, 1, 1], [], []>} : vector<16x36xf32>, vector<36x32xf32>, vector<16x32xf32> -> vector<16x32xf32>
    %c0_8 = arith.constant 0 : index
    %c0_9 = arith.constant 0 : index
    %13 = vector.load %arg3[%c0_8, %c0_9] : memref<1x32xf32, #tpu.memory_space<vmem>>, vector<1x32xf32>
    %14 = vector.broadcast %13 : vector<1x32xf32> to vector<16x32xf32>
    %15 = arith.addf %12, %14 : vector<16x32xf32>
    %16 = math.tanh %15 : vector<16x32xf32>
    %c0_10 = arith.constant 0 : index
    %c0_11 = arith.constant 0 : index
    %17 = vector.load %arg4[%c0_10, %c0_11] : memref<32x144xf32, #tpu.memory_space<vmem>>, vector<32x144xf32>
    %cst_12 = arith.constant dense<0.000000e+00> : vector<16x144xf32>
    %18 = tpu.matmul %16, %17, %cst_12 {dimension_numbers = #tpu.dot_dimension_numbers<[1], [0], [0], [1], [0, 0, 1, 1], [], []>} : vector<16x32xf32>, vector<32x144xf32>, vector<16x144xf32> -> vector<16x144xf32>
    %c0_13 = arith.constant 0 : index
    %c0_14 = arith.constant 0 : index
    %19 = vector.load %arg5[%c0_13, %c0_14] : memref<1x144xf32, #tpu.memory_space<vmem>>, vector<1x144xf32>
    %20 = vector.broadcast %19 : vector<1x144xf32> to vector<16x144xf32>
    %21 = arith.addf %18, %20 : vector<16x144xf32>
    %c0_15 = arith.constant 0 : index
    %c0_16 = arith.constant 0 : index
    %22 = vector.load %arg7[%c0_15, %c0_16] : memref<16x144xf32, #tpu.memory_space<vmem>>, vector<16x144xf32>
    tpu.vector_store %arg7[%c0_15, %c0_16], %21 {strides = array<i32>} : memref<16x144xf32, #tpu.memory_space<vmem>>, vector<16x144xf32>,
    return
  }
  func.func @transform_0(%arg0: i32) -> (i32, i32) {
    %c0_i32 = arith.constant 0 : i32
    %c0_i32_0 = arith.constant 0 : i32
    return %arg0, %c0_i32 : i32, i32
  }
  func.func @transform_1(%arg0: i32) -> (i32, i32) {
    %c0_i32 = arith.constant 0 : i32
    %c0_i32_0 = arith.constant 0 : i32
    %c0_i32_1 = arith.constant 0 : i32
    return %c0_i32, %c0_i32_0 : i32, i32
  }
  func.func @transform_2(%arg0: i32) -> (i32, i32) {
    %c0_i32 = arith.constant 0 : i32
    %c0_i32_0 = arith.constant 0 : i32
    %c0_i32_1 = arith.constant 0 : i32
    return %c0_i32, %c0_i32_0 : i32, i32
  }
  func.func @transform_3(%arg0: i32) -> (i32, i32) {
    %c0_i32 = arith.constant 0 : i32
    %c0_i32_0 = arith.constant 0 : i32
    %c0_i32_1 = arith.constant 0 : i32
    return %c0_i32, %c0_i32_0 : i32, i32
  }
  func.func @transform_4(%arg0: i32) -> (i32, i32) {
    %c0_i32 = arith.constant 0 : i32
    %c0_i32_0 = arith.constant 0 : i32
    %c0_i32_1 = arith.constant 0 : i32
    return %c0_i32, %c0_i32_0 : i32, i32
  }
  func.func @transform_5(%arg0: i32) -> (i32, i32) {
    %c0_i32 = arith.constant 0 : i32
    %c0_i32_0 = arith.constant 0 : i32
    %c0_i32_1 = arith.constant 0 : i32
    return %c0_i32, %c0_i32_0 : i32, i32
  }
  func.func @transform_6(%arg0: i32) -> (i32, i32) {
    %c0_i32 = arith.constant 0 : i32
    %c0_i32_0 = arith.constant 0 : i32
    return %arg0, %c0_i32 : i32, i32
  }
}

</mosaic_0001>

<bundles_post_ra>
// kernel: tpu_custom_call.1
= control target key start
LH: loop header
LB: loop body
LE: loop exit
PB: predicated region body
PF: predicated region fallthrough
CT: control target
= control target key end

     0   :  { %11 = vsyncpa [#allocation3], 0  ;;  %s363_s0 = inlined_call_operand.hbm [shape: f32[16,36], index: 0, kind: input, shape index: {}]   ;;  %s364_s1 = inlined_call_operand.vmem [shape: f32[36,32], index: 1, kind: input, shape index: {}]   ;;  %s365_s2 = inlined_call_operand.vmem [shape: f32[1,32], index: 2, kind: input, shape index: {}]   ;;  %s366_s3 = inlined_call_operand.vmem [shape: f32[32,144], index: 3, kind: input, shape index: {}]   ;;  %s367_s4 = inlined_call_operand.vmem [shape: f32[1,144], index: 4, kind: input, shape index: {}]   ;;  %s368_s5 = inlined_call_operand.vmem [shape: f32[1,36], index: 5, kind: input, shape index: {}]   ;;  %s369_s6 = inlined_call_operand.hbm [shape: f32[16,144], index: 6, kind: output, shape index: {}]  }
   0x1   :  { %12 = vsyncpa [#allocation4], 0  ;;  %s17_s23 = sshll.u32 %s363_s0, 4  ;;  %s267_s24 = smov [#allocation2]   ;;  %s18_s23 = int_to_ptr.hbm [resolvable:$true] %s17_s23 }
   0x2   :  { %s19_s25 = sshll.u32 %s267_s24, 4  ;;  %s268_s26 = smov 128   ;;  %s20_s25 = int_to_ptr.vmem [resolvable:$true] %s19_s25 }
   0x3   :  { %s269_s27 = smov 8  }
   0x4   :  { %25 = dma.hbm_to_vmem [thread:$0]  %s18_s23, 256, %s20_s25, [#allocation3], %s268_s26, %s268_s26, %s269_s27  }
   0x5   :  { %263 = dma.done.wait [#allocation3], 256  }
   0x6   :  { %264 = vsyncadd [#allocation3], 4294967040  ;;  %vm69_vm0 = vcmask 1043456   ;;  %v57_v0 = vld [vmem:[%s364_s1 + $0x20] sm:$0xf]  ;;  %v56_v1 = vld [vmem:[%s364_s1 + $0x18] sm:$0xff] }
   0x7   :  { %191 = vmatpush.msk.msra.mxu0 %vm69_vm0, %v57_v0  ;;  %198 = vmatpush.msk.msra.mxu3 %vm69_vm0, %v57_v0  ;;  %v55_v2 = vld [vmem:[%s364_s1 + $0x10] sm:$0xff]  ;;  %v40_v3 = vld [vmem:[#allocation2] sm:$0xff]  ;;  %v41_v5 = vld [vmem:[#allocation2 + $0x8] sm:$0xff]  ;;  %v270_v8 = vmov 0   ;;  %vm62_vm3 = vcmask 293888   ;;  %vm112_vm4 = vcmask 261120  }
   0x8   :  { %v42_v4 = vld [vmem:[%s368_s5] sm:$0x1]  ;;  %v54_v6 = vld [vmem:[%s364_s1 + $0x8] sm:$0xff]  ;;  %v189_v7 = vclamps-f32 %v40_v3, 1.0  ;;  %v190_v10 = vclamps-f32 %v41_v5, 1.0  ;;  %v104_v15 = vld [vmem:[%s366_s3 + $0x30] sm:$0xff] }
   0x9   :  { %85 = vmatpush.msra.mxu0 %v56_v1  ;;  %199 = vmatpush.msra.mxu3 %v56_v1  ;;  %vm43_vm1 = vcmp.gt.f32.partialorder %v42_v4, 0.5  ;;  %v53_v12 = vld [vmem:[%s364_s1] sm:$0xff]  ;;  %v105_v16 = vld [vmem:[%s366_s3 + $0x38] sm:$0xff]  ;;  %v103_v18 = vld [vmem:[%s366_s3 + $0x28] sm:$0xff]  ;;  %vm166_vm5 = vcmask 130048   ;;  %s176_s10 = sshll.u32 %s369_s6, 4  ;;  %s177_s10 = int_to_ptr.hbm [resolvable:$true] %s176_s10 }
   0xa   :  { %v48_v9 = vsel %vm43_vm1, 1, %v270_v8  ;;  %131 = vmatpush.msra.mxu1 %v104_v15  ;;  %154 = vmatpush.msra.mxu2 %v105_v16  ;;  %v102_v17 = vld [vmem:[%s366_s3 + $0x20] sm:$0xff]  ;;  %v100_v19 = vld [vmem:[%s366_s3 + $0x10] sm:$0xff]  ;;  %v101_v20 = vld [vmem:[%s366_s3 + $0x18] sm:$0xff]  ;;  %s273_s11 = smov 16  }
   0xb   :  { %86 = vmatpush.msra.mxu0 %v55_v2  ;;  %200 = vmatpush.msra.mxu3 %v55_v2  ;;  %v49_v11 = vperm.slane %v48_v9, 0  ;;  %v98_v21 = vld [vmem:[%s366_s3] sm:$0xff]  ;;  %v99_v22 = vld [vmem:[%s366_s3 + $0x8] sm:$0xff] }
   0xc   :  { %132 = vmatpush.msra.mxu1 %v102_v17  ;;  %155 = vmatpush.msra.mxu2 %v103_v18  ;;  %v210_v23 = vld [vmem:[%s365_s2] ss:$0 sm:$0xff]  ;;  %s271_s2 = smov [#allocation5]  }
   0xd   :  { %87 = vmatpush.msra.mxu0 %v54_v6  ;;  %201 = vmatpush.msra.mxu3 %v54_v6  ;;  %vm50_vm2 = vcmp.eq.s32.totalorder %v49_v11, 1  ;;  %v106_v30 = vld [vmem:[%s367_s4] sm:$0x3]  ;;  %s174_s0 = sshll.u32 %s271_s2, 4  ;;  %s272_s4 = smov 256   ;;  %s175_s0 = int_to_ptr.vmem [resolvable:$true] %s174_s0 }
   0xe   :  { %v51_v13 = vsel %vm50_vm2, %v189_v7, %v40_v3  ;;  %v52_v14 = vsel %vm50_vm2, %v190_v10, %v41_v5  ;;  %133 = vmatpush.msra.mxu1 %v100_v19  ;;  %156 = vmatpush.msra.mxu2 %v101_v20  ;;  %v108_v31 = vperm.slane %v106_v30, 0  ;;  %v109_v34 = vperm.slane %v106_v30, 1 }
   0xf   :  { %88 = vmatpush.msra.mxu0 %v53_v12  ;;  %202 = vmatpush.msra.mxu3 %v53_v12 }
  0x10   :  { %192 = vmatmul.msk.f32.vlgmr.msra.gmra.mxu0 %vm62_vm3, %v51_v13  ;;  %193 = vmatmul.msk.f32.vlgmr.msra.gmra.mxu3 %vm62_vm3, %v52_v14 }
  0x11   :  { %134 = vmatpush.msra.mxu1 %v98_v21  ;;  %157 = vmatpush.msra.mxu2 %v99_v22 }
  0x8d   :  { %v90_v24 = vpop.f32.mrf.mxu0 }
  0x8e   :  { %v91_v25 = vadd.f32 %v210_v23, %v90_v24 }
  0x90   :  { %211 = vtanh.f32 %v91_v25 }
  0x93   :  { %v93_v26 = vpop.f32.mrf.mxu3 }
  0x94   :  { %v94_v27 = vadd.f32 %v210_v23, %v93_v26 }
  0x96   :  { %v212_v28 = vpop.eup %211  ;;  %213 = vtanh.f32 %v94_v27 }
  0x97   :  { %194 = vmatmul.msk.f32.vlgmr.msra.gmra.mxu1 %vm112_vm4, %v212_v28  ;;  %196 = vmatmul.msk.f32.vlgmr.msra.gmra.mxu2 %vm112_vm4, %v212_v28 }
  0x9c   :  { %v214_v29 = vpop.eup %213 }
  0x9f   :  { %195 = vmatmul.msk.f32.gmra.mxu1 %vm112_vm4, %v214_v29  ;;  %197 = vmatmul.msk.f32.gmra.mxu2 %vm112_vm4, %v214_v29 }
 0x114   :  { %v136_v32 = vpop.f32.mrf.mxu1 }
 0x115   :  { %v137_v33 = vadd.f32 %v136_v32, %v108_v31 }
 0x117   :  { %165 = vst [vmem:[#allocation5] sm:$0xff] %v137_v33 }
 0x11a   :  { %v159_v35 = vpop.f32.mrf.mxu2 }
 0x11b   :  { %v160_v36 = vadd.f32 %v159_v35, %v109_v34 }
 0x11c   :  { %v139_v37 = vpop.f32.mrf.mxu1 }
 0x11d   :  { %167 = vst.msk [vmem:[#allocation5 + $0x8] sm:$0xff] %vm166_vm5, %v160_v36  ;;  %v140_v38 = vadd.f32 %v139_v37, %v108_v31 }
 0x11f   :  { %168 = vst [vmem:[#allocation5 + $0x10] sm:$0xff] %v140_v38 }
 0x122   :  { %v162_v39 = vpop.f32.mrf.mxu2 }
 0x123   :  { %v163_v40 = vadd.f32 %v162_v39, %v109_v34 }
 0x125   :  { %169 = vst.msk [vmem:[#allocation5 + $0x18] sm:$0xff] %vm166_vm5, %v163_v40 }
 0x126   :  { %182 = dma.vmem_to_hbm [thread:$0]  %s175_s0, 512, %s177_s10, [#allocation4], %s272_s4, %s272_s4, %s273_s11  }
 0x127   :  { %265 = dma.done.wait [#allocation4], 512  }
 0x128   :  { %266 = vsyncadd [#allocation4], 4294966784 }
 0x129   :  { %187 = vsyncpa [#allocation3], 1 }
 0x12a   :  { %188 = vsyncpa [#allocation4], 1 }

</bundles_post_ra>
